<compile_context>
chip_gen: v6e
topology: v6e:2x2x1
jax: 0.10.0
libtpu: 0.0.40
codegen_flags: <defaults>
</compile_context>

<pallas_src>
import math

import jax
import jax.numpy as jnp
from jax.experimental import pallas as pl
from jax.experimental.pallas import tpu as pltpu

D_IN = 64
D_HID = 32
D_OUT = 64


def _mlp_kernel(x_ref, w1_ref, b1_ref, w2_ref, b2_ref, o_ref):
    # x_ref:  (TM, P*64)    w1_ref: (P*64, P*32)   b1_ref: (1, P*32)
    # w2_ref: (P*32, P*64)  b2_ref: (1, P*64)      o_ref:  (TM, P*64)
    x = x_ref[...]
    y1 = jnp.dot(x, w1_ref[...], preferred_element_type=jnp.float32) + b1_ref[...]
    y3 = y1 * jax.nn.sigmoid(y1)          # SiLU gate (sigmoid runs on the EUP)
    out = jnp.dot(y3, w2_ref[...], preferred_element_type=jnp.float32) + b2_ref[...]
    o_ref[...] = out.astype(o_ref.dtype)


def _max_pack_for_chip():
    """Row-packing factor cap: 4 on v6e/v7x (256-wide MXU, big slack), 2 on
    v5e and older so the redundant block-diagonal f32 flops keep the kernel
    memory-bound."""
    try:
        kind = jax.devices()[0].device_kind.lower()
    except Exception:
        return 2
    for old in ("v2", "v3", "v4", "v5"):
        if old in kind:
            return 2
    return 4


def mlp_forward(x, w1, b1, w2, b2, *, tm_rows=8192, pack=None):
    """x: (..., 64) float32. Returns (..., 64) float32."""
    assert x.shape[-1] == D_IN
    lead = x.shape[:-1]
    M = int(math.prod(lead)) if lead else 1
    if M == 0:                                      # degenerate batch
        return jnp.zeros((*lead, D_OUT), x.dtype)

    cap = _max_pack_for_chip() if pack is None else pack
    P = 1
    for cand in (4, 2):
        if cand <= cap and M % cand == 0:
            P = cand
            break

    Mp = M // P
    din, dhid, dout = P * D_IN, P * D_HID, P * D_OUT

    # Free (contiguous) reshape: P consecutive logical rows -> 1 physical row.
    x2d = x.reshape(Mp, din)

    # Block-diagonal weights / tiled biases (tiny, VMEM-resident).
    eye = jnp.eye(P, dtype=w1.dtype)
    w1p = jnp.kron(eye, w1)                          # (P*64, P*32)
    w2p = jnp.kron(eye, w2)                          # (P*32, P*64)
    b1p = jnp.tile(b1.reshape(1, D_HID), (1, P))     # (1, P*32)
    b2p = jnp.tile(b2.reshape(1, D_OUT), (1, P))     # (1, P*64)

    # Row tile in packed rows (tm_rows is in logical rows).
    tm = max(8, (tm_rows // P) // 8 * 8)
    TM = Mp if Mp <= tm else tm                      # full block, or multiple of 8
    grid = (pl.cdiv(Mp, TM),)                        # partial last block is masked

    weight_bytes = (w1p.size + b1p.size + w2p.size + b2p.size) * 4
    cost = pl.CostEstimate(
        flops=2 * Mp * (din * dhid + dhid * dout),
        transcendentals=Mp * dhid,
        bytes_accessed=Mp * (din + dout) * 4 + weight_bytes,
    )

    out2d = pl.pallas_call(
        _mlp_kernel,
        out_shape=jax.ShapeDtypeStruct((Mp, dout), jnp.float32),
        grid=grid,
        in_specs=[
            pl.BlockSpec((TM, din), lambda i: (i, 0)),      # streamed x tiles
            pl.BlockSpec((din, dhid), lambda i: (0, 0)),    # resident weights
            pl.BlockSpec((1, dhid), lambda i: (0, 0)),
            pl.BlockSpec((dhid, dout), lambda i: (0, 0)),
            pl.BlockSpec((1, dout), lambda i: (0, 0)),
        ],
        out_specs=pl.BlockSpec((TM, dout), lambda i: (i, 0)),
        compiler_params=pltpu.CompilerParams(
            dimension_semantics=("parallel",),
            vmem_limit_bytes=32 * 1024 * 1024,
        ),
        cost_estimate=cost,
    )(x2d, w1p, b1p, w2p, b2p)

    # Free (contiguous) reshape back to logical rows.
    return out2d.reshape(*lead, D_OUT)


def init_params(key):
    """Mirrors torch.nn.Linear's U(-1/sqrt(fan_in), 1/sqrt(fan_in)) init.
    Weights are stored pre-transposed as (in_features, out_features)."""
    k1, k2, k3, k4 = jax.random.split(key, 4)
    bound1 = 1.0 / math.sqrt(D_IN)
    bound2 = 1.0 / math.sqrt(D_HID)
    w1 = jax.random.uniform(k1, (D_IN, D_HID), jnp.float32, -bound1, bound1)
    b1 = jax.random.uniform(k2, (D_HID,), jnp.float32, -bound1, bound1)
    w2 = jax.random.uniform(k3, (D_HID, D_OUT), jnp.float32, -bound2, bound2)
    b2 = jax.random.uniform(k4, (D_OUT,), jnp.float32, -bound2, bound2)
    return w1, b1, w2, b2


def reference(x, w1, b1, w2, b2):
    y1 = x @ w1 + b1
    y3 = y1 * jax.nn.sigmoid(y1)
    return y3 @ w2 + b2


if __name__ == "__main__":
    key = jax.random.PRNGKey(0)
    kx, kx2, kp = jax.random.split(key, 3)
    w1, b1, w2, b2 = init_params(kp)

    # Small shapes consistent with the module: batch=2, seq=8, feature=64.
    B, S = 2, 8
    x = jax.random.normal(kx, (B, S, D_IN), jnp.float32)
    out = mlp_forward(x, w1, b1, w2, b2)
    jax.block_until_ready(out)
    ref = reference(x, w1, b1, w2, b2)
    assert out.shape == (B, S, D_OUT)
    # Loose-ish tolerance: MXU f32 matmuls may take a reduced-precision pass
    # depending on default matmul precision inside vs. outside the kernel.
    assert jnp.allclose(out, ref, atol=1e-2, rtol=1e-2)

    # Odd row count exercises the pack-factor fallback (P=1) path.
    x_odd = jax.random.normal(kx2, (3, 5, D_IN), jnp.float32)
    out_odd = mlp_forward(x_odd, w1, b1, w2, b2)
    jax.block_until_ready(out_odd)
    assert jnp.allclose(out_odd, reference(x_odd, w1, b1, w2, b2),
                        atol=1e-2, rtol=1e-2)

    print("KERNEL_OK")
</pallas_src>

<mosaic_0001>
module attributes {stable_mosaic.version = 11 : i64} {
  func.func @_mlp_kernel(%arg0: i32, %arg1: memref<4x256xf32, #tpu.memory_space<vmem>>, %arg2: memref<256x128xf32, #tpu.memory_space<vmem>>, %arg3: memref<1x128xf32, #tpu.memory_space<vmem>>, %arg4: memref<128x256xf32, #tpu.memory_space<vmem>>, %arg5: memref<1x256xf32, #tpu.memory_space<vmem>>, %arg6: memref<4x256xf32, #tpu.memory_space<vmem>>) attributes {dimension_semantics = [#tpu.dimension_semantics<parallel>], iteration_bounds = array<i64: 1>, scalar_prefetch = 0 : i64, scratch_operands = 0 : i64, tpu.core_type = #tpu.core_type<tc>, window_params = [{transform_indices = @transform_0, window_bounds = array<i64: 4, 256>}, {pipeline_mode = #tpu.pipeline_mode<synchronous>, transform_indices = @transform_1, window_bounds = array<i64: 256, 128>}, {pipeline_mode = #tpu.pipeline_mode<synchronous>, transform_indices = @transform_2, window_bounds = array<i64: 1, 128>}, {pipeline_mode = #tpu.pipeline_mode<synchronous>, transform_indices = @transform_3, window_bounds = array<i64: 128, 256>}, {pipeline_mode = #tpu.pipeline_mode<synchronous>, transform_indices = @transform_4, window_bounds = array<i64: 1, 256>}, {transform_indices = @transform_5, window_bounds = array<i64: 4, 256>}]} {
    %c0 = arith.constant 0 : index
    %c0_0 = arith.constant 0 : index
    %0 = vector.load %arg1[%c0, %c0_0] : memref<4x256xf32, #tpu.memory_space<vmem>>, vector<4x256xf32>
    %c0_1 = arith.constant 0 : index
    %c0_2 = arith.constant 0 : index
    %1 = vector.load %arg2[%c0_1, %c0_2] : memref<256x128xf32, #tpu.memory_space<vmem>>, vector<256x128xf32>
    %cst = arith.constant dense<0.000000e+00> : vector<4x128xf32>
    %2 = tpu.matmul %0, %1, %cst {dimension_numbers = #tpu.dot_dimension_numbers<[1], [0], [0], [1], [0, 0, 1, 1], [], []>} : vector<4x256xf32>, vector<256x128xf32>, vector<4x128xf32> -> vector<4x128xf32>
    %c0_3 = arith.constant 0 : index
    %c0_4 = arith.constant 0 : index
    %3 = vector.load %arg3[%c0_3, %c0_4] : memref<1x128xf32, #tpu.memory_space<vmem>>, vector<1x128xf32>
    %4 = vector.broadcast %3 : vector<1x128xf32> to vector<4x128xf32>
    %5 = arith.addf %2, %4 : vector<4x128xf32>
    %6 = arith.negf %5 : vector<4x128xf32>
    %7 = math.exp %6 : vector<4x128xf32>
    %cst_5 = arith.constant 1.000000e+00 : f32
    %8 = vector.broadcast %cst_5 : f32 to vector<4x128xf32>
    %9 = arith.addf %8, %7 : vector<4x128xf32>
    %10 = arith.divf %8, %9 : vector<4x128xf32>
    %11 = arith.mulf %5, %10 : vector<4x128xf32>
    %c0_6 = arith.constant 0 : index
    %c0_7 = arith.constant 0 : index
    %12 = vector.load %arg4[%c0_6, %c0_7] : memref<128x256xf32, #tpu.memory_space<vmem>>, vector<128x256xf32>
    %cst_8 = arith.constant dense<0.000000e+00> : vector<4x256xf32>
    %13 = tpu.matmul %11, %12, %cst_8 {dimension_numbers = #tpu.dot_dimension_numbers<[1], [0], [0], [1], [0, 0, 1, 1], [], []>} : vector<4x128xf32>, vector<128x256xf32>, vector<4x256xf32> -> vector<4x256xf32>
    %c0_9 = arith.constant 0 : index
    %c0_10 = arith.constant 0 : index
    %14 = vector.load %arg5[%c0_9, %c0_10] : memref<1x256xf32, #tpu.memory_space<vmem>>, vector<1x256xf32>
    %15 = vector.broadcast %14 : vector<1x256xf32> to vector<4x256xf32>
    %16 = arith.addf %13, %15 : vector<4x256xf32>
    %c0_11 = arith.constant 0 : index
    %c0_12 = arith.constant 0 : index
    %17 = vector.load %arg6[%c0_11, %c0_12] : memref<4x256xf32, #tpu.memory_space<vmem>>, vector<4x256xf32>
    tpu.vector_store %arg6[%c0_11, %c0_12], %16 {strides = array<i32>} : memref<4x256xf32, #tpu.memory_space<vmem>>, vector<4x256xf32>,
    return
  }
  func.func @transform_0(%arg0: i32) -> (i32, i32) {
    %c0_i32 = arith.constant 0 : i32
    %c0_i32_0 = arith.constant 0 : i32
    return %arg0, %c0_i32 : i32, i32
  }
  func.func @transform_1(%arg0: i32) -> (i32, i32) {
    %c0_i32 = arith.constant 0 : i32
    %c0_i32_0 = arith.constant 0 : i32
    %c0_i32_1 = arith.constant 0 : i32
    return %c0_i32, %c0_i32_0 : i32, i32
  }
  func.func @transform_2(%arg0: i32) -> (i32, i32) {
    %c0_i32 = arith.constant 0 : i32
    %c0_i32_0 = arith.constant 0 : i32
    %c0_i32_1 = arith.constant 0 : i32
    return %c0_i32, %c0_i32_0 : i32, i32
  }
  func.func @transform_3(%arg0: i32) -> (i32, i32) {
    %c0_i32 = arith.constant 0 : i32
    %c0_i32_0 = arith.constant 0 : i32
    %c0_i32_1 = arith.constant 0 : i32
    return %c0_i32, %c0_i32_0 : i32, i32
  }
  func.func @transform_4(%arg0: i32) -> (i32, i32) {
    %c0_i32 = arith.constant 0 : i32
    %c0_i32_0 = arith.constant 0 : i32
    %c0_i32_1 = arith.constant 0 : i32
    return %c0_i32, %c0_i32_0 : i32, i32
  }
  func.func @transform_5(%arg0: i32) -> (i32, i32) {
    %c0_i32 = arith.constant 0 : i32
    %c0_i32_0 = arith.constant 0 : i32
    return %arg0, %c0_i32 : i32, i32
  }
}

</mosaic_0001>

<bundles_post_ra>
// kernel: tpu_custom_call.1
= control target key start
LH: loop header
LB: loop body
LE: loop exit
PB: predicated region body
PF: predicated region fallthrough
CT: control target
= control target key end

     0   :  { %10 = vsyncpa [#allocation3], 0  ;;  %s510_s0 = inlined_call_operand.hbm [shape: f32[4,256], index: 0, kind: input, shape index: {}]   ;;  %s511_s1 = inlined_call_operand.hbm [shape: f32[256,128], index: 1, kind: input, shape index: {}]   ;;  %s512_s2 = inlined_call_operand.vmem [shape: f32[1,128], index: 2, kind: input, shape index: {}]   ;;  %s513_s3 = inlined_call_operand.hbm [shape: f32[128,256], index: 3, kind: input, shape index: {}]   ;;  %s514_s4 = inlined_call_operand.vmem [shape: f32[1,256], index: 4, kind: input, shape index: {}]   ;;  %s515_s5 = inlined_call_operand.hbm [shape: f32[4,256], index: 5, kind: output, shape index: {}]  }
   0x1   :  { %11 = vsyncpa [#allocation6], 0 }
   0x2   :  { %12 = vsyncpa [#allocation4], 0  ;;  %s453_s18 = smov [#allocation5]  }
   0x3   :  { %s28_s19 = sshll.u32 %s453_s18, 4  ;;  %s29_s19 = int_to_ptr.vmem [resolvable:$true] %s28_s19 }
   0x4   :  { %s375_s20 = scalar_lea.vmem %s29_s19, 4096  ;;  %p380_p1 = scmp.lt.s32.totalorder %s29_s19, %s29_s19 }
   0x5   :  { %p376_p0 = scmp.ne.s32.totalorder %s29_s19, %s375_s20  ;;  %p381_p2 = scmp.lt.s32.totalorder %s375_s20, %s375_s20 }
   0x7   :  { %p382_p3 = por %p381_p2, %p380_p1 }
   0x9   :  { %p383_p4 = pnand %p382_p3, %p376_p0 }
   0xb   :  { %386 = shalt.err (!%p383_p4)
}
   0xc   :  { %s454_s21 = smov 128   ;;  %s455_s22 = smov 8  }
   0xd   :  { %34 = dma.hbm_to_vmem [thread:$0]  %s511_s1, 4096, %s29_s19, [#allocation6], %s454_s21, %s454_s21, %s455_s22  }
   0xe   :  { %s456_s25 = smov [#allocation2]   ;;  %s457_s27 = smov [#allocation7]  }
   0xf   :  { %s19_s26 = sshll.u32 %s456_s25, 4  ;;  %s42_s28 = sshll.u32 %s457_s27, 4  ;;  %s20_s26 = int_to_ptr.vmem [resolvable:$true] %s19_s26  ;;  %s43_s28 = int_to_ptr.vmem [resolvable:$true] %s42_s28 }
  0x10   :  { %s395_s29 = scalar_lea.vmem %s20_s26, 128  ;;  %p400_p6 = scmp.lt.s32.totalorder %s20_s26, %s20_s26 }
  0x11   :  { %p396_p5 = scmp.ne.s32.totalorder %s20_s26, %s395_s29  ;;  %p401_p7 = scmp.lt.s32.totalorder %s395_s29, %s395_s29 }
  0x13   :  { %p402_p8 = por %p401_p7, %p400_p6 }
  0x15   :  { %p403_p9 = pnand %p402_p8, %p396_p5 }
  0x17   :  { %406 = shalt.err (!%p403_p9)
}
  0x18   :  { %22 = dma.hbm_to_vmem [thread:$0]  %s510_s0, 128, %s20_s26, [#allocation3]  }
  0x19   :  { %s415_s7 = scalar_lea.vmem %s43_s28, 4096  ;;  %p420_p11 = scmp.lt.s32.totalorder %s43_s28, %s43_s28 }
  0x1a   :  { %p416_p10 = scmp.ne.s32.totalorder %s43_s28, %s415_s7  ;;  %p421_p12 = scmp.lt.s32.totalorder %s415_s7, %s415_s7 }
  0x1c   :  { %p422_p13 = por %p421_p12, %p420_p11 }
  0x1e   :  { %p423_p0 = pnand %p422_p13, %p416_p10 }
  0x20   :  { %426 = shalt.err (!%p423_p0)
}
  0x21   :  { %s458_s1 = smov 256   ;;  %s459_s8 = smov 16  }
  0x22   :  { %48 = dma.hbm_to_vmem [thread:$0]  %s513_s3, 4096, %s43_s28, [#allocation6], %s458_s1, %s458_s1, %s459_s8  }
  0x23   :  { %447 = dma.done.wait [#allocation3], 128  }
  0x24   :  { %448 = vsyncadd [#allocation3], 4294967168 }
  0x25   :  { %449 = dma.done.wait [#allocation6], 8192  }
  0x26   :  { %450 = vsyncadd [#allocation6], 4294959104  ;;  %v92_v0 = vld [vmem:[#allocation5 + $0xf8] sm:$0xff]  ;;  %v91_v2 = vld [vmem:[#allocation5 + $0xf0] sm:$0xff]  ;;  %v460_v55 = vmov 0.0  }
  0x27   :  { %v76_v1 = vld [vmem:[#allocation5 + $0x78] sm:$0xff]  ;;  %318 = vmatprep.subr.mxu0 %v92_v0  ;;  %v75_v3 = vld [vmem:[#allocation5 + $0x70] sm:$0xff]  ;;  %v90_v4 = vld [vmem:[#allocation5 + $0xe8] sm:$0xff]  ;;  %288 = vmatprep.mubr.f32.mxu1 %v460_v55 }
  0x28   :  { %319 = vmatpush3.msra.mxu0 %v76_v1  ;;  %v74_v5 = vld [vmem:[#allocation5 + $0x68] sm:$0xff]  ;;  %v89_v6 = vld [vmem:[#allocation5 + $0xe0] sm:$0xff]  ;;  %v88_v8 = vld [vmem:[#allocation5 + $0xd8] sm:$0xff] }
  0x29   :  { %320 = vmatprep.subr.mxu0 %v91_v2  ;;  %v73_v7 = vld [vmem:[#allocation5 + $0x60] sm:$0xff]  ;;  %v72_v9 = vld [vmem:[#allocation5 + $0x58] sm:$0xff]  ;;  %v87_v10 = vld [vmem:[#allocation5 + $0xd0] sm:$0xff] }
  0x2a   :  { %321 = vmatpush3.msra.mxu0 %v75_v3  ;;  %v71_v11 = vld [vmem:[#allocation5 + $0x50] sm:$0xff]  ;;  %v86_v12 = vld [vmem:[#allocation5 + $0xc8] sm:$0xff]  ;;  %v60_v13 = vld [vmem:[#allocation2] sm:$0xff] }
  0x2b   :  { %322 = vmatprep.subr.mxu0 %v90_v4  ;;  %v70_v14 = vld [vmem:[#allocation5 + $0x48] sm:$0xff]  ;;  %v101_v15 = vcombine.high %v60_v13, %v60_v13  ;;  %v85_v16 = vld [vmem:[#allocation5 + $0xc0] sm:$0xff]  ;;  %v84_v18 = vld [vmem:[#allocation5 + $0xb8] sm:$0xff] }
  0x2c   :  { %323 = vmatpush3.msra.mxu0 %v74_v5  ;;  %v69_v17 = vld [vmem:[#allocation5 + $0x40] sm:$0xff]  ;;  %v68_v19 = vld [vmem:[#allocation5 + $0x38] sm:$0xff]  ;;  %v83_v20 = vld [vmem:[#allocation5 + $0xb0] sm:$0xff] }
  0x2d   :  { %324 = vmatprep.subr.mxu0 %v89_v6  ;;  %167 = vmatprep.mubr.f32.mxu0 %v101_v15  ;;  %v67_v21 = vld [vmem:[#allocation5 + $0x30] sm:$0xff]  ;;  %v82_v22 = vld [vmem:[#allocation5 + $0xa8] sm:$0xff]  ;;  %v81_v24 = vld [vmem:[#allocation5 + $0xa0] sm:$0xff] }
  0x2e   :  { %325 = vmatpush3.msra.mxu0 %v73_v7  ;;  %v66_v23 = vld [vmem:[#allocation5 + $0x28] sm:$0xff]  ;;  %v65_v25 = vld [vmem:[#allocation5 + $0x20] sm:$0xff]  ;;  %v80_v26 = vld [vmem:[#allocation5 + $0x98] sm:$0xff] }
  0x2f   :  { %326 = vmatprep.subr.mxu0 %v88_v8  ;;  %v64_v27 = vld [vmem:[#allocation5 + $0x18] sm:$0xff]  ;;  %v79_v28 = vld [vmem:[#allocation5 + $0x90] sm:$0xff]  ;;  %v78_v30 = vld [vmem:[#allocation5 + $0x88] sm:$0xff] }
  0x30   :  { %327 = vmatpush3.msra.mxu0 %v72_v9  ;;  %v63_v29 = vld [vmem:[#allocation5 + $0x10] sm:$0xff]  ;;  %v62_v31 = vld [vmem:[#allocation5 + $0x8] sm:$0xff]  ;;  %v77_v32 = vld [vmem:[#allocation5 + $0x80] sm:$0xff] }
  0x31   :  { %328 = vmatprep.subr.mxu0 %v87_v10  ;;  %v61_v33 = vld [vmem:[#allocation5] sm:$0xff]  ;;  %v211_v34 = vld [vmem:[#allocation7 + $0xf8] sm:$0xff]  ;;  %v210_v35 = vld [vmem:[#allocation7 + $0xf0] sm:$0xff] }
  0x32   :  { %329 = vmatpush3.msra.mxu0 %v71_v11  ;;  %224 = vmatprep.subr.mxu1 %v211_v34  ;;  %v209_v36 = vld [vmem:[#allocation7 + $0xe8] sm:$0xff]  ;;  %v208_v37 = vld [vmem:[#allocation7 + $0xe0] sm:$0xff]  ;;  %v207_v38 = vld [vmem:[#allocation7 + $0xd8] sm:$0xff] }
  0x33   :  { %330 = vmatprep.subr.mxu0 %v86_v12  ;;  %225 = vmatpush1.msra.mxu1 %v210_v35  ;;  %v206_v39 = vld [vmem:[#allocation7 + $0xd0] sm:$0xff]  ;;  %v205_v40 = vld [vmem:[#allocation7 + $0xc8] sm:$0xff]  ;;  %v204_v41 = vld [vmem:[#allocation7 + $0xc0] sm:$0xff] }
  0x34   :  { %331 = vmatpush3.msra.mxu0 %v70_v14  ;;  %226 = vmatprep.subr.mxu1 %v209_v36  ;;  %v203_v42 = vld [vmem:[#allocation7 + $0xb8] sm:$0xff]  ;;  %v202_v43 = vld [vmem:[#allocation7 + $0xb0] sm:$0xff]  ;;  %v201_v44 = vld [vmem:[#allocation7 + $0xa8] sm:$0xff] }
  0x35   :  { %332 = vmatprep.subr.mxu0 %v85_v16  ;;  %227 = vmatpush1.msra.mxu1 %v208_v37  ;;  %v200_v45 = vld [vmem:[#allocation7 + $0xa0] sm:$0xff]  ;;  %v199_v46 = vld [vmem:[#allocation7 + $0x98] sm:$0xff]  ;;  %v198_v47 = vld [vmem:[#allocation7 + $0x90] sm:$0xff] }
  0x36   :  { %333 = vmatpush3.msra.mxu0 %v69_v17  ;;  %228 = vmatprep.subr.mxu1 %v207_v38  ;;  %v197_v48 = vld [vmem:[#allocation7 + $0x88] sm:$0xff]  ;;  %v196_v49 = vld [vmem:[#allocation7 + $0x80] sm:$0xff]  ;;  %v195_v50 = vld [vmem:[#allocation7 + $0x78] sm:$0xff] }
  0x37   :  { %334 = vmatprep.subr.mxu0 %v84_v18  ;;  %229 = vmatpush1.msra.mxu1 %v206_v39  ;;  %v194_v51 = vld [vmem:[#allocation7 + $0x70] sm:$0xff]  ;;  %v193_v52 = vld [vmem:[#allocation7 + $0x68] sm:$0xff]  ;;  %v192_v53 = vld [vmem:[#allocation7 + $0x60] sm:$0xff] }
  0x38   :  { %335 = vmatpush3.msra.mxu0 %v68_v19  ;;  %230 = vmatprep.subr.mxu1 %v205_v40  ;;  %v191_v54 = vld [vmem:[#allocation7 + $0x58] sm:$0xff]  ;;  %v190_v56 = vld [vmem:[#allocation7 + $0x50] sm:$0xff]  ;;  %v189_v57 = vld [vmem:[#allocation7 + $0x48] sm:$0xff] }
  0x39   :  { %336 = vmatprep.subr.mxu0 %v83_v20  ;;  %231 = vmatpush1.msra.mxu1 %v204_v41  ;;  %v188_v58 = vld [vmem:[#allocation7 + $0x40] sm:$0xff]  ;;  %v187_v59 = vld [vmem:[#allocation7 + $0x38] sm:$0xff]  ;;  %v186_v60 = vld [vmem:[#allocation7 + $0x30] sm:$0xff] }
  0x3a   :  { %337 = vmatpush3.msra.mxu0 %v67_v21  ;;  %232 = vmatprep.subr.mxu1 %v203_v42  ;;  %v185_v61 = vld [vmem:[#allocation7 + $0x28] sm:$0xff]  ;;  %v184_v62 = vld [vmem:[#allocation7 + $0x20] sm:$0xff]  ;;  %v183_v63 = vld [vmem:[#allocation7 + $0x18] sm:$0xff] }
  0x3b   :  { %338 = vmatprep.subr.mxu0 %v82_v22  ;;  %233 = vmatpush1.msra.mxu1 %v202_v43  ;;  %v182_v0 = vld [vmem:[#allocation7 + $0x10] sm:$0xff]  ;;  %v181_v1 = vld [vmem:[#allocation7 + $0x8] sm:$0xff]  ;;  %v180_v2 = vld [vmem:[#allocation7] sm:$0xff] }
  0x3c   :  { %339 = vmatpush3.msra.mxu0 %v66_v23  ;;  %234 = vmatprep.subr.mxu1 %v201_v44  ;;  %v316_v4 = vld [vmem:[%s512_s2] ss:$0 sm:$0xff]  ;;  %s461_s2 = smov [#allocation8]  }
  0x3d   :  { %340 = vmatprep.subr.mxu0 %v81_v24  ;;  %235 = vmatpush1.msra.mxu1 %v200_v45  ;;  %v212_v17 = vld [vmem:[%s514_s4] sm:$0x3]  ;;  %s306_s13 = sshll.u32 %s461_s2, 4  ;;  %s307_s13 = int_to_ptr.vmem [resolvable:$true] %s306_s13 }
  0x3e   :  { %341 = vmatpush3.msra.mxu0 %v65_v25  ;;  %236 = vmatprep.subr.mxu1 %v199_v46  ;;  %s427_s14 = scalar_lea.vmem %s307_s13, 128  ;;  %p432_p2 = scmp.lt.s32.totalorder %s307_s13, %s307_s13 }
  0x3f   :  { %342 = vmatprep.subr.mxu0 %v80_v26  ;;  %237 = vmatpush1.msra.mxu1 %v198_v47  ;;  %p428_p1 = scmp.ne.s32.totalorder %s307_s13, %s427_s14  ;;  %p433_p3 = scmp.lt.s32.totalorder %s427_s14, %s427_s14 }
  0x40   :  { %343 = vmatpush3.msra.mxu0 %v64_v27  ;;  %238 = vmatprep.subr.mxu1 %v197_v48 }
  0x41   :  { %344 = vmatprep.subr.mxu0 %v79_v28  ;;  %239 = vmatpush1.msra.mxu1 %v196_v49  ;;  %p434_p4 = por %p433_p3, %p432_p2 }
  0x42   :  { %345 = vmatpush3.msra.mxu0 %v63_v29  ;;  %240 = vmatprep.subr.mxu1 %v195_v50 }
  0x43   :  { %346 = vmatprep.subr.mxu0 %v78_v30  ;;  %241 = vmatpush1.msra.mxu1 %v194_v51  ;;  %p435_p5 = pnand %p434_p4, %p428_p1 }
  0x44   :  { %347 = vmatpush3.msra.mxu0 %v62_v31  ;;  %242 = vmatprep.subr.mxu1 %v193_v52 }
  0x45   :  { %348 = vmatprep.subr.mxu0 %v77_v32  ;;  %243 = vmatpush1.msra.mxu1 %v192_v53 }
  0x46   :  { %349 = vmatpush3.msra.mxu0 %v61_v33  ;;  %244 = vmatprep.subr.mxu1 %v191_v54 }
  0x47   :  { %168 = vmatmul.mubr.f32.vlgmr.msra.gmra.mxu0 %v60_v13  ;;  %245 = vmatpush1.msra.mxu1 %v190_v56  ;;  %v214_v13 = vlaneseq }
  0x48   :  { %246 = vmatprep.subr.mxu1 %v189_v57 }
  0x49   :  { %247 = vmatpush1.msra.mxu1 %v188_v58  ;;  %v215_v14 = vshrl.u32 %v214_v13, 7 }
  0x4a   :  { %248 = vmatprep.subr.mxu1 %v187_v59 }
  0x4b   :  { %249 = vmatpush1.msra.mxu1 %v186_v60  ;;  %v216_v15 = vsub.s32 0, %v215_v14  ;;  %v220_v16 = vsub.s32 1, %v215_v14 }
  0x4c   :  { %250 = vmatprep.subr.mxu1 %v185_v61 }
  0x4d   :  { %251 = vmatpush1.msra.mxu1 %v184_v62  ;;  %v217_v18 = vrot.slane %v212_v17, %v216_v15  ;;  %v221_v19 = vrot.slane %v212_v17, %v220_v16 }
  0x4e   :  { %252 = vmatprep.subr.mxu1 %v183_v63 }
  0x4f   :  { %253 = vmatpush1.msra.mxu1 %v182_v0 }
  0x50   :  { %254 = vmatprep.subr.mxu1 %v181_v1 }
  0x51   :  { %255 = vmatpush1.msra.mxu1 %v180_v2 }
 0x107   :  { %v350_v3 = vpop.f32.mrf.mxu0 }
 0x109   :  { %v351_v5 = vpop.f32.mrf.mxu0 }
 0x10a   :  { %v352_v6 = vadd.f32 %v351_v5, %v350_v3 }
 0x10c   :  { %v170_v7 = vadd.f32 %v352_v6, %v316_v4 }
 0x10e   :  { %v317_v8 = vmul.f32 -1.442695, %v170_v7 }
 0x110   :  { %363 = vpow2.f32 %v317_v8 }
 0x11d   :  { %v364_v9 = vpop.eup %363 }
 0x11e   :  { %v176_v10 = vadd.f32 1.0, %v364_v9 }
 0x120   :  { %365 = vrcp.f32 %v176_v10 }
 0x12d   :  { %v366_v11 = vpop.eup %365 }
 0x12e   :  { %v179_v12 = vmul.f32 %v366_v11, %v170_v7 }
 0x130   :  { %289 = vmatmul.mubr.f32.vlgmr.msra.gmra.mxu1 %v179_v12 }
 0x1f0   :  { %v290_v20 = vpop.f32.mrf.mxu1 }
 0x1f1   :  { %v291_v22 = vadd.f32 %v290_v20, %v217_v18 }
 0x1f2   :  { %v292_v21 = vpop.f32.mrf.mxu1 }
 0x1f3   :  { %v293_v23 = vadd.f32 %v292_v21, %v221_v19 }
 0x1f5   :  { %v297_v24 = vcombine.low %v291_v22, %v293_v23 }
 0x1f7   :  { %299 = vst [vmem:[#allocation8] sm:$0xff] %v297_v24 }
 0x1f8   :  { %438 = shalt.err (!%p435_p5)
}
 0x1f9   :  { %309 = dma.vmem_to_hbm [thread:$0]  %s307_s13, 128, %s515_s5, [#allocation4]  }
 0x1fa   :  { %451 = dma.done.wait [#allocation4], 128  }
 0x1fb   :  { %452 = vsyncadd [#allocation4], 4294967168 }
 0x1fc   :  { %313 = vsyncpa [#allocation3], 1 }
 0x1fd   :  { %314 = vsyncpa [#allocation6], 1 }
 0x1fe   :  { %315 = vsyncpa [#allocation4], 1 }

</bundles_post_ra>
